<compile_context>
chip_gen: v6e
topology: v6e:2x2x1
jax: 0.10.0
libtpu: 0.0.40
codegen_flags: <defaults>
</compile_context>

<pallas_src>
import jax
import jax.numpy as jnp
from jax.experimental import pallas as pl
from jax.experimental.pallas import tpu as pltpu


def _conv1x1_kernel(x_ref, w_ref, b_ref, o_ref):
    """1x1 conv over all images in one block; Cin contraction on the VPU.

    x_ref: (N, Cin, M)   zero-padded activations, lanes = flattened spatial
    w_ref: (Cout, Cin)   weight
    b_ref: (Cout, 1)     bias column
    o_ref: (N, Cout, M)  output (unpadded Cout / M)
    """
    w = w_ref[...]                              # (Cout, Cin)
    b = b_ref[...]                              # (Cout, 1)
    n, cin, _ = x_ref.shape
    for i in range(n):                          # N is tiny & static -> unrolled
        x = x_ref[i]                            # (Cin, M)
        acc = b + w[:, 0:1] * x[0:1, :]         # bias folded into acc init
        for c in range(1, cin):
            acc = acc + w[:, c:c + 1] * x[c:c + 1, :]
        o_ref[i] = acc.astype(o_ref.dtype)


@jax.jit
def conv1x1_pad1(x_nchw, weight, bias):
    """Conv2d(Cin, Cout, kernel_size=1, stride=1, padding=1), NCHW in/out."""
    n, cin, h, w = x_nchw.shape
    cout = weight.shape[0]
    hp, wp = h + 2, w + 2
    m = hp * wp

    # Single glue op: spatial zero-pad (stays NCHW, no transposes anywhere).
    x_pad = jnp.pad(x_nchw, ((0, 0), (0, 0), (1, 1), (1, 1)))   # (N,Cin,Hp,Wp)
    x_rows = x_pad.reshape(n, cin, m)                           # lanes=spatial
    b_col = bias.reshape(cout, 1)

    itemsize = jnp.dtype(x_nchw.dtype).itemsize
    out_rows = pl.pallas_call(
        _conv1x1_kernel,
        out_shape=jax.ShapeDtypeStruct((n, cout, m), x_nchw.dtype),
        in_specs=[
            pl.BlockSpec(memory_space=pltpu.MemorySpace.VMEM),
            pl.BlockSpec(memory_space=pltpu.MemorySpace.VMEM),
            pl.BlockSpec(memory_space=pltpu.MemorySpace.VMEM),
        ],
        out_specs=pl.BlockSpec(memory_space=pltpu.MemorySpace.VMEM),
        cost_estimate=pl.CostEstimate(
            flops=2 * n * cout * cin * m,
            transcendentals=0,
            bytes_accessed=(n * cin * m + cout * cin + cout + n * cout * m)
            * itemsize,
        ),
    )(x_rows, weight, b_col)

    # Contiguous reshape back to (N, Cout, Hp, Wp) -- no slice, no transpose.
    return out_rows.reshape(n, cout, hp, wp)


def model_forward(x1, weight, bias):
    v1 = conv1x1_pad1(x1, weight, bias)
    # v2 = v1 * v1 / v1  -> dead code in the reference module
    # torch.transpose(v1, 1, 1) is the identity
    return v1


def _reference(x_nchw, weight, bias):
    # pure-JAX reference of Conv2d(3, 7, 1, stride=1, padding=1)
    x_pad = jnp.pad(x_nchw, ((0, 0), (0, 0), (1, 1), (1, 1)))
    return jnp.einsum("nchw,oc->nohw", x_pad, weight) + bias[None, :, None, None]


if __name__ == "__main__":
    key = jax.random.PRNGKey(0)
    kx, kw, kb = jax.random.split(key, 3)

    # small shapes consistent with the module: N=2, Cin=3, H=W=16
    x1 = jax.random.normal(kx, (2, 3, 16, 16), dtype=jnp.float32)

    # Conv2d(3, 7, kernel_size=1) parameters, deterministic init
    cin, cout = 3, 7
    bound = 1.0 / (cin ** 0.5)
    weight = jax.random.uniform(kw, (cout, cin), jnp.float32, -bound, bound)
    bias = jax.random.uniform(kb, (cout,), jnp.float32, -bound, bound)

    out = model_forward(x1, weight, bias)
    out = jax.block_until_ready(out)

    ref = jax.block_until_ready(jax.jit(_reference)(x1, weight, bias))

    assert out.shape == (2, 7, 18, 18), out.shape
    assert jnp.allclose(out, ref, atol=1e-5, rtol=1e-5)

    print("KERNEL_OK")
</pallas_src>

<mosaic_0001>
module attributes {stable_mosaic.version = 11 : i64} {
  func.func @_conv1x1_kernel(%arg0: memref<2x3x324xf32, #tpu.memory_space<vmem>>, %arg1: memref<7x3xf32, #tpu.memory_space<vmem>>, %arg2: memref<7x1xf32, #tpu.memory_space<vmem>>, %arg3: memref<2x7x324xf32, #tpu.memory_space<vmem>>) attributes {dimension_semantics = [], scalar_prefetch = 0 : i64, scratch_operands = 0 : i64, tpu.core_type = #tpu.core_type<tc>} {
    %c0 = arith.constant 0 : index
    %c0_0 = arith.constant 0 : index
    %0 = vector.load %arg1[%c0, %c0_0] : memref<7x3xf32, #tpu.memory_space<vmem>>, vector<7x3xf32>
    %c0_1 = arith.constant 0 : index
    %c0_2 = arith.constant 0 : index
    %1 = vector.load %arg2[%c0_1, %c0_2] : memref<7x1xf32, #tpu.memory_space<vmem>>, vector<7x1xf32>
    %c0_3 = arith.constant 0 : index
    %c0_4 = arith.constant 0 : index
    %c0_5 = arith.constant 0 : index
    %2 = vector.load %arg0[%c0_3, %c0_4, %c0_5] : memref<2x3x324xf32, #tpu.memory_space<vmem>>, vector<1x3x324xf32>
    %3 = vector.shape_cast %2 : vector<1x3x324xf32> to vector<3x324xf32>
    %4 = vector.extract_strided_slice %0 {offsets = [0, 0], sizes = [7, 1], strides = [1, 1]} : vector<7x3xf32> to vector<7x1xf32>
    %5 = vector.extract_strided_slice %3 {offsets = [0, 0], sizes = [1, 324], strides = [1, 1]} : vector<3x324xf32> to vector<1x324xf32>
    %6 = vector.broadcast %4 : vector<7x1xf32> to vector<7x324xf32>
    %7 = vector.broadcast %5 : vector<1x324xf32> to vector<7x324xf32>
    %8 = arith.mulf %6, %7 : vector<7x324xf32>
    %9 = vector.broadcast %1 : vector<7x1xf32> to vector<7x324xf32>
    %10 = arith.addf %9, %8 : vector<7x324xf32>
    %11 = vector.extract_strided_slice %0 {offsets = [0, 1], sizes = [7, 1], strides = [1, 1]} : vector<7x3xf32> to vector<7x1xf32>
    %12 = vector.extract_strided_slice %3 {offsets = [1, 0], sizes = [1, 324], strides = [1, 1]} : vector<3x324xf32> to vector<1x324xf32>
    %13 = vector.broadcast %11 : vector<7x1xf32> to vector<7x324xf32>
    %14 = vector.broadcast %12 : vector<1x324xf32> to vector<7x324xf32>
    %15 = arith.mulf %13, %14 : vector<7x324xf32>
    %16 = arith.addf %10, %15 : vector<7x324xf32>
    %17 = vector.extract_strided_slice %0 {offsets = [0, 2], sizes = [7, 1], strides = [1, 1]} : vector<7x3xf32> to vector<7x1xf32>
    %18 = vector.extract_strided_slice %3 {offsets = [2, 0], sizes = [1, 324], strides = [1, 1]} : vector<3x324xf32> to vector<1x324xf32>
    %19 = vector.broadcast %17 : vector<7x1xf32> to vector<7x324xf32>
    %20 = vector.broadcast %18 : vector<1x324xf32> to vector<7x324xf32>
    %21 = arith.mulf %19, %20 : vector<7x324xf32>
    %22 = arith.addf %16, %21 : vector<7x324xf32>
    %c0_6 = arith.constant 0 : index
    %c0_7 = arith.constant 0 : index
    %c0_8 = arith.constant 0 : index
    %23 = vector.load %arg3[%c0_6, %c0_7, %c0_8] : memref<2x7x324xf32, #tpu.memory_space<vmem>>, vector<1x7x324xf32>
    %24 = vector.shape_cast %23 : vector<1x7x324xf32> to vector<7x324xf32>
    %25 = vector.shape_cast %22 : vector<7x324xf32> to vector<1x7x324xf32>
    tpu.vector_store %arg3[%c0_6, %c0_7, %c0_8], %25 {strides = array<i32>} : memref<2x7x324xf32, #tpu.memory_space<vmem>>, vector<1x7x324xf32>,
    %c1 = arith.constant 1 : index
    %c0_9 = arith.constant 0 : index
    %c0_10 = arith.constant 0 : index
    %26 = vector.load %arg0[%c1, %c0_9, %c0_10] : memref<2x3x324xf32, #tpu.memory_space<vmem>>, vector<1x3x324xf32>
    %27 = vector.shape_cast %26 : vector<1x3x324xf32> to vector<3x324xf32>
    %28 = vector.extract_strided_slice %0 {offsets = [0, 0], sizes = [7, 1], strides = [1, 1]} : vector<7x3xf32> to vector<7x1xf32>
    %29 = vector.extract_strided_slice %27 {offsets = [0, 0], sizes = [1, 324], strides = [1, 1]} : vector<3x324xf32> to vector<1x324xf32>
    %30 = vector.broadcast %28 : vector<7x1xf32> to vector<7x324xf32>
    %31 = vector.broadcast %29 : vector<1x324xf32> to vector<7x324xf32>
    %32 = arith.mulf %30, %31 : vector<7x324xf32>
    %33 = vector.broadcast %1 : vector<7x1xf32> to vector<7x324xf32>
    %34 = arith.addf %33, %32 : vector<7x324xf32>
    %35 = vector.extract_strided_slice %0 {offsets = [0, 1], sizes = [7, 1], strides = [1, 1]} : vector<7x3xf32> to vector<7x1xf32>
    %36 = vector.extract_strided_slice %27 {offsets = [1, 0], sizes = [1, 324], strides = [1, 1]} : vector<3x324xf32> to vector<1x324xf32>
    %37 = vector.broadcast %35 : vector<7x1xf32> to vector<7x324xf32>
    %38 = vector.broadcast %36 : vector<1x324xf32> to vector<7x324xf32>
    %39 = arith.mulf %37, %38 : vector<7x324xf32>
    %40 = arith.addf %34, %39 : vector<7x324xf32>
    %41 = vector.extract_strided_slice %0 {offsets = [0, 2], sizes = [7, 1], strides = [1, 1]} : vector<7x3xf32> to vector<7x1xf32>
    %42 = vector.extract_strided_slice %27 {offsets = [2, 0], sizes = [1, 324], strides = [1, 1]} : vector<3x324xf32> to vector<1x324xf32>
    %43 = vector.broadcast %41 : vector<7x1xf32> to vector<7x324xf32>
    %44 = vector.broadcast %42 : vector<1x324xf32> to vector<7x324xf32>
    %45 = arith.mulf %43, %44 : vector<7x324xf32>
    %46 = arith.addf %40, %45 : vector<7x324xf32>
    %c1_11 = arith.constant 1 : index
    %c0_12 = arith.constant 0 : index
    %c0_13 = arith.constant 0 : index
    %47 = vector.load %arg3[%c1_11, %c0_12, %c0_13] : memref<2x7x324xf32, #tpu.memory_space<vmem>>, vector<1x7x324xf32>
    %48 = vector.shape_cast %47 : vector<1x7x324xf32> to vector<7x324xf32>
    %49 = vector.shape_cast %46 : vector<7x324xf32> to vector<1x7x324xf32>
    tpu.vector_store %arg3[%c1_11, %c0_12, %c0_13], %49 {strides = array<i32>} : memref<2x7x324xf32, #tpu.memory_space<vmem>>, vector<1x7x324xf32>,
    return
  }
}

</mosaic_0001>

<bundles_post_ra>
// kernel: conv1x1_pad1.1
= control target key start
LH: loop header
LB: loop body
LE: loop exit
PB: predicated region body
PF: predicated region fallthrough
CT: control target
= control target key end

     0   :  { %v265_v0 = vmov 0   ;;  %v266_v1 = vmov 1   ;;  %v267_v4 = vmov 2   ;;  %v25_v5 = vlaneseq  ;;  %s338_s1 = inlined_call_operand.vmem [shape: f32[7,3], index: 1, kind: input, shape index: {}]   ;;  %s339_s2 = inlined_call_operand.vmem [shape: f32[7,1], index: 2, kind: input, shape index: {}]   ;;  %s340_s0 = inlined_call_operand.vmem [shape: f32[2,3,324], index: 0, kind: input, shape index: {}]   ;;  %s341_s3 = inlined_call_operand.vmem [shape: f32[2,7,324], index: 3, kind: output, shape index: {}]  }
   0x1   :  { %261 = vset.pattern.permute.xlu0 %v265_v0  ;;  %262 = vset.pattern.permute.xlu1 %v266_v1  ;;  %v14_v2 = vld [vmem:[%s338_s1] sm:$0x7f]  ;;  %v17_v11 = vld [vmem:[%s340_s0 + $0x8] sm:$0x7]  ;;  %v253_v13 = vld [vmem:[%s340_s0 + $0xc] sm:$0x77] }
   0x2   :  { %20 = vperm.xlu0 %261, %v14_v2   ;;  %64 = vperm.xlu1 %262, %v14_v2   ;;  %v15_v3 = vld [vmem:[%s339_s2] sm:$0x7f]  ;;  %v26_v6 = vshrl.u32 %v25_v5, 7  ;;  %v254_v15 = vld [vmem:[%s340_s0 + $0x14] sm:$0x7]  ;;  %vm139_vm0 = vcmask 555008  }
   0x3   :  { %v16_v9 = vld [vmem:[%s340_s0] sm:$0x77] }
   0x4   :  { %v69_v7 = vsub.s32 1, %v26_v6  ;;  %v73_v8 = vsub.s32 5, %v26_v6  ;;  %v27_v10 = vsub.s32 0, %v26_v6  ;;  %v31_v16 = vsub.s32 4, %v26_v6 }
   0x5   :  { %v306_v17 = vsub.s32 2, %v26_v6  ;;  %v110_v18 = vsub.s32 6, %v26_v6 }
   0x6   :  { %57 = vperm.xlu0 %261, %v15_v3   ;;  %263 = vset.pattern.permute.xlu1 %v267_v4  ;;  %v70_v12 = vrot.slane %v16_v9, %v69_v7  ;;  %v74_v14 = vrot.slane %v16_v9, %v73_v8  ;;  %v78_v19 = vrot.slane %v17_v11, %v69_v7 }
   0x7   :  { %101 = vperm.xlu1 %263, %v14_v2   ;;  %v182_v20 = vrot.slane %v253_v13, %v69_v7  ;;  %v186_v22 = vrot.slane %v253_v13, %v73_v8  ;;  %v190_v23 = vrot.slane %v254_v15, %v69_v7  ;;  %v28_v24 = vrot.slane %v16_v9, %v27_v10 }
   0x8   :  { %v85_v21 = vrot.slane %v70_v12, %v69_v7  ;;  %v89_v25 = vrot.slane %v74_v14, %v69_v7  ;;  %v32_v26 = vrot.slane %v16_v9, %v31_v16  ;;  %v36_v27 = vrot.slane %v17_v11, %v27_v10 }
   0x9   :  { %v149_v28 = vrot.slane %v253_v13, %v27_v10  ;;  %v153_v29 = vrot.slane %v253_v13, %v31_v16  ;;  %v157_v30 = vrot.slane %v254_v15, %v27_v10  ;;  %v107_v31 = vrot.slane %v16_v9, %v306_v17 }
   0xa   :  { %264 = vset.pattern.permute.xlu0 %v267_v4  ;;  %v111_v32 = vrot.slane %v16_v9, %v110_v18  ;;  %v115_v33 = vrot.slane %v17_v11, %v306_v17  ;;  %v215_v34 = vrot.slane %v253_v13, %v306_v17  ;;  %v219_v35 = vrot.slane %v253_v13, %v110_v18 }
   0xb   :  { %v223_v36 = vrot.slane %v254_v15, %v306_v17  ;;  %v93_v37 = vrot.slane %v78_v19, %v69_v7  ;;  %v197_v38 = vrot.slane %v182_v20, %v69_v7  ;;  %v201_v39 = vrot.slane %v186_v22, %v69_v7 }
   0xc   :  { %v205_v40 = vrot.slane %v190_v23, %v69_v7  ;;  %v43_v41 = vrot.slane %v28_v24, %v27_v10  ;;  %v47_v42 = vrot.slane %v32_v26, %v27_v10  ;;  %v51_v43 = vrot.slane %v36_v27, %v27_v10 }
   0xd   :  { %v164_v44 = vrot.slane %v149_v28, %v27_v10  ;;  %v168_v47 = vrot.slane %v153_v29, %v27_v10  ;;  %v172_v48 = vrot.slane %v157_v30, %v27_v10  ;;  %v122_v49 = vrot.slane %v107_v31, %v306_v17 }
   0xe   :  { %v126_v50 = vrot.slane %v111_v32, %v306_v17  ;;  %v130_v51 = vrot.slane %v115_v33, %v306_v17  ;;  %v230_v52 = vrot.slane %v215_v34, %v306_v17  ;;  %v234_v53 = vrot.slane %v219_v35, %v306_v17 }
   0xf   :  { %v238_v54 = vrot.slane %v223_v36, %v306_v17 }
  0x7d   :  { %v21_v45 = vpop.permute.xlu0 %20  ;;  %v65_v46 = vpop.permute.xlu1 %64 }
  0x7e   :  { %v94_v55 = vmul.f32 %v85_v21, %v65_v46  ;;  %v95_v56 = vmul.f32 %v89_v25, %v65_v46  ;;  %v96_v57 = vmul.f32 %v93_v37, %v65_v46  ;;  %v206_v58 = vmul.f32 %v197_v38, %v65_v46 }
  0x7f   :  { %v52_v59 = vmul.f32 %v43_v41, %v21_v45  ;;  %v53_v60 = vmul.f32 %v47_v42, %v21_v45  ;;  %v54_v61 = vmul.f32 %v51_v43, %v21_v45  ;;  %v173_v62 = vmul.f32 %v164_v44, %v21_v45 }
  0x80   :  { %v207_v63 = vmul.f32 %v201_v39, %v65_v46  ;;  %v208_v0 = vmul.f32 %v205_v40, %v65_v46  ;;  %v174_v2 = vmul.f32 %v168_v47, %v21_v45  ;;  %v175_v3 = vmul.f32 %v172_v48, %v21_v45 }
  0x81   :  { %v58_v1 = vpop.permute.xlu0 %57 }
  0x82   :  { %v60_v4 = vadd.f32 %v58_v1, %v52_v59  ;;  %v61_v5 = vadd.f32 %v58_v1, %v53_v60  ;;  %v62_v6 = vadd.f32 %v58_v1, %v54_v61  ;;  %v176_v7 = vadd.f32 %v173_v62, %v58_v1  ;;  %v102_v8 = vpop.permute.xlu1 %101 }
  0x83   :  { %v177_v9 = vadd.f32 %v174_v2, %v58_v1  ;;  %v178_v10 = vadd.f32 %v175_v3, %v58_v1  ;;  %v131_v11 = vmul.f32 %v122_v49, %v102_v8  ;;  %v132_v12 = vmul.f32 %v126_v50, %v102_v8 }
  0x84   :  { %v97_v13 = vadd.f32 %v94_v55, %v60_v4  ;;  %v98_v14 = vadd.f32 %v95_v56, %v61_v5  ;;  %v99_v15 = vadd.f32 %v96_v57, %v62_v6  ;;  %v209_v16 = vadd.f32 %v206_v58, %v176_v7 }
  0x85   :  { %v210_v17 = vadd.f32 %v207_v63, %v177_v9  ;;  %v211_v18 = vadd.f32 %v208_v0, %v178_v10  ;;  %v133_v19 = vmul.f32 %v130_v51, %v102_v8  ;;  %v239_v20 = vmul.f32 %v230_v52, %v102_v8 }
  0x86   :  { %v134_v21 = vadd.f32 %v131_v11, %v97_v13  ;;  %v135_v22 = vadd.f32 %v132_v12, %v98_v14  ;;  %v240_v23 = vmul.f32 %v234_v53, %v102_v8  ;;  %v241_v24 = vmul.f32 %v238_v54, %v102_v8 }
  0x87   :  { %v136_v25 = vadd.f32 %v133_v19, %v99_v15  ;;  %v242_v26 = vadd.f32 %v239_v20, %v209_v16 }
  0x88   :  { %137 = vst [vmem:[%s341_s3] sm:$0x7f] %v134_v21  ;;  %138 = vst [vmem:[%s341_s3 + $0x8] sm:$0x7f] %v135_v22  ;;  %v243_v27 = vadd.f32 %v240_v23, %v210_v17  ;;  %v244_v28 = vadd.f32 %v241_v24, %v211_v18 }
  0x89   :  { %140 = vst.msk [vmem:[%s341_s3 + $0x10] sm:$0x7f] %vm139_vm0, %v136_v25  ;;  %255 = vst [vmem:[%s341_s3 + $0x18] sm:$0x7f] %v242_v26 }
  0x8a   :  { %256 = vst [vmem:[%s341_s3 + $0x20] sm:$0x7f] %v243_v27  ;;  %257 = vst.msk [vmem:[%s341_s3 + $0x28] sm:$0x7f] %vm139_vm0, %v244_v28 }

</bundles_post_ra>
